<compile_context>
chip_gen: v6e
topology: v6e:2x2x1
jax: 0.10.0
libtpu: 0.0.40
codegen_flags: <defaults>
</compile_context>

<pallas_src>
import jax
import jax.numpy as jnp
from jax.experimental import pallas as pl
from jax.experimental.pallas import tpu as pltpu

# ----------------------------- module config --------------------------------
EMB_DIM = 32
FEATURE_DIMS = ((5, 7, 3, 11), 4)      # (categorical vocab sizes, n scalar feats)
SIGMA_DIM = 2                          # appended to scalar features
LM_EMBED_TYPE = "esm"
LM_EMBED_DIM = 1280
N_FEATS_TO_USE = 3                     # only first 3 categorical feats get embedded
USE_BIAS = False
N_ATOMS = 16

NUM_ONEHOT = len(FEATURE_DIMS[0])                       # 4
SCALAR_DIM = FEATURE_DIMS[1] + SIGMA_DIM                # 6
N_USED = min(N_FEATS_TO_USE, NUM_ONEHOT) if N_FEATS_TO_USE is not None else NUM_ONEHOT
VOCAB_DIMS = FEATURE_DIMS[0][:N_USED]                   # (5, 7, 3)
VOCAB_TOTAL = int(sum(VOCAB_DIMS))                      # 15
OFFSETS = tuple(int(sum(VOCAB_DIMS[:i])) for i in range(N_USED))   # (0, 5, 12)

D_TOTAL = NUM_ONEHOT + SCALAR_DIM + LM_EMBED_DIM        # 1290
X_MAIN = (D_TOTAL // 128) * 128                         # 1280 (128-aligned main dot K)
TAIL = D_TOTAL - X_MAIN                                 # 10 trailing LM columns
SMALL_K = 128                                           # one-hot/tail dot K (aligned)
assert TAIL + VOCAB_TOTAL <= SMALL_K

TILE_N_MAX = 1024                      # rows per grid step (fits default VMEM)
MIN_GRID = 4                           # aim for >=4 grid steps (v7x megacore)
_HI = jax.lax.Precision.HIGHEST


# ------------------------------- kernel -------------------------------------
def atom_encoder_kernel(x_ref, w_main_ref, w_small_ref, out_ref, feat_scr):
    # x_ref      : [T, D_TOTAL] f32  full feature rows (idx | scal | lm)
    # w_main_ref : [X_MAIN, 32] f32  combined folded weight (resident in VMEM)
    # w_small_ref: [128, 32]    f32  rows 0..9 = lm tail weight, 10..24 = emb table
    # feat_scr   : [T, 128]     f32  VMEM scratch for the small-features lhs

    # (1) Main MXU contraction over the 128-aligned leading columns:
    #     raw index columns hit zero rows, scalar columns hit the folded
    #     scalar_lin slice, LM dims 0..1269 hit the lm_lin slice.
    acc = jnp.dot(x_ref[:, :X_MAIN], w_main_ref[...],
                  preferred_element_type=jnp.float32)            # [T, 32]

    # (2) Build the small-features block in VMEM:
    #     lanes [0, TAIL)                -> the last TAIL LM columns of x
    #     lanes [TAIL, TAIL+VOCAB_TOTAL) -> one-hot of the categorical indices
    lanes = jax.lax.broadcasted_iota(jnp.int32, feat_scr.shape, 1)
    oh = jnp.zeros(feat_scr.shape, jnp.float32)
    for i in range(N_USED):
        tgt = x_ref[:, i:i + 1].astype(jnp.int32) + (TAIL + OFFSETS[i])
        oh = oh + (lanes == tgt).astype(jnp.float32)
    feat_scr[...] = oh
    feat_scr[:, :TAIL] = x_ref[:, X_MAIN:]                       # masked narrow store

    # (3) Second MXU dot (K=128) folds the embedding lookup + LM tail into acc.
    out_ref[...] = acc + jnp.dot(feat_scr[...], w_small_ref[...],
                                 preferred_element_type=jnp.float32)


# --------------------------- one-time param prep ------------------------------
def prepare_params(params):
    """Fold the residual Linear layers into two kernel weights (done ONCE).

      x1 = sum_i Emb_i[idx_i]
      x2 = x1 + scalar_lin([x1, scal]) = x1 (I+Ws_e^T) + scal Ws_s^T
      x3 = x2 + lm_lin([x2, lm])
         = x1 (I+Ws_e^T)(I+Wl_e^T) + scal Ws_s^T(I+Wl_e^T) + lm Wl_l^T
    """
    emb_tab, w_scalar, w_lm = params
    eye = jnp.eye(EMB_DIM, dtype=jnp.float32)
    ws_e = w_scalar[:, :EMB_DIM].T            # (32, 32)
    ws_s = w_scalar[:, EMB_DIM:].T            # (SCALAR_DIM, 32)
    wl_e = w_lm[:, :EMB_DIM].T                # (32, 32)
    wl_l = w_lm[:, EMB_DIM:].T                # (LM_EMBED_DIM, 32)

    m = jnp.dot(eye + ws_e, eye + wl_e, precision=_HI)            # (32, 32)
    emb_fold = jnp.dot(emb_tab, m, precision=_HI)                 # (VOCAB_TOTAL, 32)
    ws_fold = jnp.dot(ws_s, eye + wl_e, precision=_HI)            # (SCALAR_DIM, 32)

    lm_main = X_MAIN - NUM_ONEHOT - SCALAR_DIM                    # 1270 LM dims in main dot
    w_main = jnp.zeros((X_MAIN, EMB_DIM), jnp.float32)
    w_main = w_main.at[NUM_ONEHOT:NUM_ONEHOT + SCALAR_DIM].set(ws_fold)
    w_main = w_main.at[NUM_ONEHOT + SCALAR_DIM:].set(wl_l[:lm_main])

    w_small = jnp.zeros((SMALL_K, EMB_DIM), jnp.float32)
    w_small = w_small.at[:TAIL].set(wl_l[lm_main:])               # trailing LM dims
    w_small = w_small.at[TAIL:TAIL + VOCAB_TOTAL].set(emb_fold)   # folded emb table
    return jax.device_put(w_main), jax.device_put(w_small)


# ------------------------------- wrapper -------------------------------------
def _round_up(a, b):
    return (a + b - 1) // b * b


@jax.jit
def atom_encoder(x, prepped):
    """x: [N, NUM_ONEHOT + SCALAR_DIM + LM_EMBED_DIM] float32."""
    w_main, w_small = prepped
    n, d = x.shape
    assert d == D_TOTAL

    # Keep the row count a multiple of 8 so tiles never fall back to one giant
    # block (VMEM hazard on v7x).  For the common even-N case this is a no-op.
    n_pad = _round_up(max(n, 8), 8)
    if n_pad != n:
        x = jnp.pad(x, ((0, n_pad - n), (0, 0)))   # TODO(synk): rare odd-N copy

    # Big tiles amortize per-step overhead, but keep >=MIN_GRID steps so
    # dimension_semantics=("parallel",) can shard across TensorCores (v7x).
    tile_n = min(TILE_N_MAX,
                 max(8, _round_up(pl.cdiv(n_pad, MIN_GRID), 8)),
                 n_pad)
    grid = (pl.cdiv(n_pad, tile_n),)

    out = pl.pallas_call(
        atom_encoder_kernel,
        out_shape=jax.ShapeDtypeStruct((n_pad, EMB_DIM), jnp.float32),
        grid=grid,
        in_specs=[
            pl.BlockSpec((tile_n, D_TOTAL), lambda i: (i, 0)),     # x row block
            pl.BlockSpec((X_MAIN, EMB_DIM), lambda i: (0, 0)),     # resident weight
            pl.BlockSpec((SMALL_K, EMB_DIM), lambda i: (0, 0)),    # resident weight
        ],
        out_specs=pl.BlockSpec((tile_n, EMB_DIM), lambda i: (i, 0)),
        scratch_shapes=[pltpu.VMEM((tile_n, SMALL_K), jnp.float32)],
        compiler_params=pltpu.CompilerParams(
            dimension_semantics=("parallel",),
            vmem_limit_bytes=32 * 1024 * 1024),
    )(x, w_main, w_small)
    return out[:n] if n_pad != n else out


# ----------------------------- reference (pure JAX) ---------------------------
def atom_encoder_reference(x, params):
    """Faithful PyTorch-semantics forward in f32 / HIGHEST precision."""
    emb_tab, w_scalar, w_lm = params
    tables, off = [], 0
    for dv in VOCAB_DIMS:
        tables.append(emb_tab[off:off + dv])
        off += dv
    x_emb = jnp.zeros((x.shape[0], EMB_DIM), jnp.float32)
    for i in range(N_USED):
        x_emb = x_emb + tables[i][x[:, i].astype(jnp.int32)]
    scal = x[:, NUM_ONEHOT:NUM_ONEHOT + SCALAR_DIM]
    x_emb = x_emb + jnp.dot(jnp.concatenate([x_emb, scal], -1),
                            w_scalar.T, precision=_HI)
    lm = x[:, -LM_EMBED_DIM:]
    x_emb = x_emb + jnp.dot(jnp.concatenate([x_emb, lm], -1),
                            w_lm.T, precision=_HI)
    return x_emb


# ----------------------------- param / input init -----------------------------
def make_params(key):
    keys = jax.random.split(key, N_USED + 2)
    # xavier-uniform embedding tables, stacked along the vocab axis
    tabs = []
    for i, dv in enumerate(VOCAB_DIMS):
        bound = (6.0 / (dv + EMB_DIM)) ** 0.5
        tabs.append(jax.random.uniform(keys[i], (dv, EMB_DIM), jnp.float32,
                                       minval=-bound, maxval=bound))
    emb_tab = jnp.concatenate(tabs, axis=0)
    # kaiming-uniform linear weights, PyTorch (out, in) layout, no bias
    fan_s = SCALAR_DIM + EMB_DIM
    b_s = (6.0 / fan_s) ** 0.5
    w_scalar = jax.random.uniform(keys[N_USED], (EMB_DIM, fan_s), jnp.float32,
                                  minval=-b_s, maxval=b_s)
    fan_l = LM_EMBED_DIM + EMB_DIM
    b_l = (6.0 / fan_l) ** 0.5
    w_lm = jax.random.uniform(keys[N_USED + 1], (EMB_DIM, fan_l), jnp.float32,
                              minval=-b_l, maxval=b_l)
    return emb_tab, w_scalar, w_lm


def make_input(key):
    k_cat, k_scal, k_lm = jax.random.split(key, 3)
    cat_cols = []
    ks = jax.random.split(k_cat, NUM_ONEHOT)
    for i, dv in enumerate(FEATURE_DIMS[0]):
        cat_cols.append(jax.random.randint(ks[i], (N_ATOMS, 1), 0, dv).astype(jnp.float32))
    cat = jnp.concatenate(cat_cols, axis=1)                       # [N, NUM_ONEHOT]
    scal = jax.random.normal(k_scal, (N_ATOMS, SCALAR_DIM), jnp.float32)
    lm = jax.random.normal(k_lm, (N_ATOMS, LM_EMBED_DIM), jnp.float32)
    return jnp.concatenate([cat, scal, lm], axis=1)               # [N, 1290]


if __name__ == "__main__":
    key = jax.random.PRNGKey(0)
    k_param, k_input = jax.random.split(key)
    params = make_params(k_param)
    prepped = prepare_params(params)          # one-time fold into kernel weights
    x = make_input(k_input)

    out = jax.block_until_ready(atom_encoder(x, prepped))
    assert out.shape == (N_ATOMS, EMB_DIM) and out.dtype == jnp.float32
    assert bool(jnp.all(jnp.isfinite(out)))

    # Fidelity vs the full-f32 module semantics.  The K=1280 LM contraction runs
    # on the MXU at default f32 precision, so allow the corresponding tolerance.
    ref = jax.block_until_ready(atom_encoder_reference(x, params))
    max_diff = float(jnp.max(jnp.abs(out - ref)))
    assert jnp.allclose(out, ref, atol=2e-2, rtol=2e-2), \
        f"f32-reference max abs diff = {max_diff}"

    print("KERNEL_OK")
</pallas_src>

<mosaic_0001>
module attributes {stable_mosaic.version = 11 : i64} {
  func.func @atom_encoder_kernel(%arg0: i32, %arg1: memref<8x1290xf32, #tpu.memory_space<vmem>>, %arg2: memref<1280x32xf32, #tpu.memory_space<vmem>>, %arg3: memref<128x32xf32, #tpu.memory_space<vmem>>, %arg4: memref<8x32xf32, #tpu.memory_space<vmem>>, %arg5: memref<8x128xf32, #tpu.memory_space<vmem>>) attributes {dimension_semantics = [#tpu.dimension_semantics<parallel>], iteration_bounds = array<i64: 2>, scalar_prefetch = 0 : i64, scratch_operands = 1 : i64, tpu.core_type = #tpu.core_type<tc>, window_params = [{transform_indices = @transform_0, window_bounds = array<i64: 8, 1290>}, {pipeline_mode = #tpu.pipeline_mode<synchronous>, transform_indices = @transform_1, window_bounds = array<i64: 1280, 32>}, {pipeline_mode = #tpu.pipeline_mode<synchronous>, transform_indices = @transform_2, window_bounds = array<i64: 128, 32>}, {transform_indices = @transform_3, window_bounds = array<i64: 8, 32>}]} {
    %c0 = arith.constant 0 : index
    %c0_0 = arith.constant 0 : index
    %0 = vector.load %arg1[%c0, %c0_0] : memref<8x1290xf32, #tpu.memory_space<vmem>>, vector<8x1280xf32>
    %c0_1 = arith.constant 0 : index
    %c0_2 = arith.constant 0 : index
    %1 = vector.load %arg2[%c0_1, %c0_2] : memref<1280x32xf32, #tpu.memory_space<vmem>>, vector<1280x32xf32>
    %cst = arith.constant dense<0.000000e+00> : vector<8x32xf32>
    %2 = tpu.matmul %0, %1, %cst {dimension_numbers = #tpu.dot_dimension_numbers<[1], [0], [0], [1], [0, 0, 1, 1], [], []>} : vector<8x1280xf32>, vector<1280x32xf32>, vector<8x32xf32> -> vector<8x32xf32>
    %3 = tpu.iota {dimensions = array<i32: 1>} : vector<8x128xi32>
    %cst_3 = arith.constant 0.000000e+00 : f32
    %4 = vector.broadcast %cst_3 : f32 to vector<8x128xf32>
    %c0_4 = arith.constant 0 : index
    %c0_5 = arith.constant 0 : index
    %5 = vector.load %arg1[%c0_4, %c0_5] : memref<8x1290xf32, #tpu.memory_space<vmem>>, vector<8x1xf32>
    %6 = arith.fptosi %5 : vector<8x1xf32> to vector<8x1xi32>
    %c10_i32 = arith.constant 10 : i32
    %7 = vector.broadcast %c10_i32 : i32 to vector<8x1xi32>
    %8 = arith.addi %6, %7 : vector<8x1xi32>
    %9 = vector.broadcast %8 : vector<8x1xi32> to vector<8x128xi32>
    %10 = arith.cmpi eq, %3, %9 : vector<8x128xi32>
    %11 = arith.extui %10 : vector<8x128xi1> to vector<8x128xi32>
    %12 = arith.sitofp %11 : vector<8x128xi32> to vector<8x128xf32>
    %13 = arith.addf %4, %12 : vector<8x128xf32>
    %c0_6 = arith.constant 0 : index
    %c1 = arith.constant 1 : index
    %14 = vector.load %arg1[%c0_6, %c1] : memref<8x1290xf32, #tpu.memory_space<vmem>>, vector<8x1xf32>
    %15 = arith.fptosi %14 : vector<8x1xf32> to vector<8x1xi32>
    %c15_i32 = arith.constant 15 : i32
    %16 = vector.broadcast %c15_i32 : i32 to vector<8x1xi32>
    %17 = arith.addi %15, %16 : vector<8x1xi32>
    %18 = vector.broadcast %17 : vector<8x1xi32> to vector<8x128xi32>
    %19 = arith.cmpi eq, %3, %18 : vector<8x128xi32>
    %20 = arith.extui %19 : vector<8x128xi1> to vector<8x128xi32>
    %21 = arith.sitofp %20 : vector<8x128xi32> to vector<8x128xf32>
    %22 = arith.addf %13, %21 : vector<8x128xf32>
    %c0_7 = arith.constant 0 : index
    %c2 = arith.constant 2 : index
    %23 = vector.load %arg1[%c0_7, %c2] : memref<8x1290xf32, #tpu.memory_space<vmem>>, vector<8x1xf32>
    %24 = arith.fptosi %23 : vector<8x1xf32> to vector<8x1xi32>
    %c22_i32 = arith.constant 22 : i32
    %25 = vector.broadcast %c22_i32 : i32 to vector<8x1xi32>
    %26 = arith.addi %24, %25 : vector<8x1xi32>
    %27 = vector.broadcast %26 : vector<8x1xi32> to vector<8x128xi32>
    %28 = arith.cmpi eq, %3, %27 : vector<8x128xi32>
    %29 = arith.extui %28 : vector<8x128xi1> to vector<8x128xi32>
    %30 = arith.sitofp %29 : vector<8x128xi32> to vector<8x128xf32>
    %31 = arith.addf %22, %30 : vector<8x128xf32>
    %c0_8 = arith.constant 0 : index
    %c0_9 = arith.constant 0 : index
    %32 = vector.load %arg5[%c0_8, %c0_9] : memref<8x128xf32, #tpu.memory_space<vmem>>, vector<8x128xf32>
    tpu.vector_store %arg5[%c0_8, %c0_9], %31 {strides = array<i32>} : memref<8x128xf32, #tpu.memory_space<vmem>>, vector<8x128xf32>,
    %c0_10 = arith.constant 0 : index
    %c1280 = arith.constant 1280 : index
    %33 = vector.load %arg1[%c0_10, %c1280] : memref<8x1290xf32, #tpu.memory_space<vmem>>, vector<8x10xf32>
    %c0_11 = arith.constant 0 : index
    %c0_12 = arith.constant 0 : index
    %34 = vector.load %arg5[%c0_11, %c0_12] : memref<8x128xf32, #tpu.memory_space<vmem>>, vector<8x10xf32>
    tpu.vector_store %arg5[%c0_11, %c0_12], %33 {strides = array<i32>} : memref<8x128xf32, #tpu.memory_space<vmem>>, vector<8x10xf32>,
    %c0_13 = arith.constant 0 : index
    %c0_14 = arith.constant 0 : index
    %35 = vector.load %arg5[%c0_13, %c0_14] : memref<8x128xf32, #tpu.memory_space<vmem>>, vector<8x128xf32>
    %c0_15 = arith.constant 0 : index
    %c0_16 = arith.constant 0 : index
    %36 = vector.load %arg3[%c0_15, %c0_16] : memref<128x32xf32, #tpu.memory_space<vmem>>, vector<128x32xf32>
    %cst_17 = arith.constant dense<0.000000e+00> : vector<8x32xf32>
    %37 = tpu.matmul %35, %36, %cst_17 {dimension_numbers = #tpu.dot_dimension_numbers<[1], [0], [0], [1], [0, 0, 1, 1], [], []>} : vector<8x128xf32>, vector<128x32xf32>, vector<8x32xf32> -> vector<8x32xf32>
    %38 = arith.addf %2, %37 : vector<8x32xf32>
    %c0_18 = arith.constant 0 : index
    %c0_19 = arith.constant 0 : index
    %39 = vector.load %arg4[%c0_18, %c0_19] : memref<8x32xf32, #tpu.memory_space<vmem>>, vector<8x32xf32>
    tpu.vector_store %arg4[%c0_18, %c0_19], %38 {strides = array<i32>} : memref<8x32xf32, #tpu.memory_space<vmem>>, vector<8x32xf32>,
    return
  }
  func.func @transform_0(%arg0: i32) -> (i32, i32) {
    %c0_i32 = arith.constant 0 : i32
    %c0_i32_0 = arith.constant 0 : i32
    return %arg0, %c0_i32 : i32, i32
  }
  func.func @transform_1(%arg0: i32) -> (i32, i32) {
    %c0_i32 = arith.constant 0 : i32
    %c0_i32_0 = arith.constant 0 : i32
    %c0_i32_1 = arith.constant 0 : i32
    return %c0_i32, %c0_i32_0 : i32, i32
  }
  func.func @transform_2(%arg0: i32) -> (i32, i32) {
    %c0_i32 = arith.constant 0 : i32
    %c0_i32_0 = arith.constant 0 : i32
    %c0_i32_1 = arith.constant 0 : i32
    return %c0_i32, %c0_i32_0 : i32, i32
  }
  func.func @transform_3(%arg0: i32) -> (i32, i32) {
    %c0_i32 = arith.constant 0 : i32
    %c0_i32_0 = arith.constant 0 : i32
    return %arg0, %c0_i32 : i32, i32
  }
}

</mosaic_0001>

<bundles_post_ra>
// kernel: atom_encoder.1
= control target key start
LH: loop header
LB: loop body
LE: loop exit
PB: predicated region body
PF: predicated region fallthrough
CT: control target
= control target key end

     0   :  { %8 = vsyncpa [#allocation4], 0  ;;  %s1916_s0 = inlined_call_operand.vmem [shape: f32[16,1290], index: 0, kind: input, shape index: {}]   ;;  %s1917_s1 = inlined_call_operand.vmem [shape: f32[1280,32], index: 1, kind: input, shape index: {}]   ;;  %s1918_s2 = inlined_call_operand.vmem [shape: f32[128,32], index: 2, kind: input, shape index: {}]   ;;  %s1919_s3 = inlined_call_operand.hbm [shape: f32[16,32], index: 3, kind: output, shape index: {}]  }
   0x1   :  { %10 = vsyncpa [#allocation4 + $0x1], 0  ;;  %s1262_s12 = smov 0   ;;  %s1264_s13 = smov 0  }
   0x2   :  { %s1266_s14 = smov 0   ;;  %s1268_s15 = smov 0  }
   0x3 LB: > { %s1283_s16 = sadd.s32 4294967295, %s1234_s15   ;;  %s883_s17 = sadd.s32 4294967294, %s1234_s15   ;;  %s1234_s15 = sphi %s1268_s15, %s1925_s15   ;;  %s1230_s14 = sphi %s1266_s14, %s1924_s14   ;;  %s1226_s13 = sphi %s1264_s13, %s1923_s13   ;;  %s1222_s12 = sphi %s1262_s12, %s1922_s12  }
   0x4   : > { %s1287_s18 = sadd.s32 1, %s1234_s15   ;;  %s91_s19 = sadd.s32 1, %s1230_s14 }
   0x5   : > { %s88_s20 = ssub.s32 %s1234_s15, %s1287_s18  ;;  %p101_p0 = scmp.ne.s32.totalorder %s1230_s14, %s1226_s13 }
   0x6   : > { %p89_p1 = scmp.eq.s32.totalorder %s88_s20, 0  ;;  %p102_p2 = scmp.eq.s32.totalorder %s1283_s16, 1 }
   0x7   : > { %p107_p3 = scmp.ne.s32.totalorder %s1226_s13, %s1222_s12  ;;  %p108_p4 = scmp.eq.s32.totalorder %s883_s17, 1 }
   0x8   : > { %s1298_s21 = scalar_select %p89_p1, %s1230_s14, %s91_s19  }
   0x9   : > { %p1300_p5 = por %p102_p2, %p101_p0  ;;  %p1304_p6 = por %p108_p4, %p107_p3 }
   0xa   : > { %p886_p7 = scmp.ge.s32.totalorder %s1234_s15, 1  ;;  %p140_p8 = scmp.lt.s32.totalorder %s1234_s15, 3 }
   0xc   : > { %p141_p9 = pnand %p886_p7, %p140_p8 }
   0xd   : > { %p164_p10 = scmp.lt.s32.totalorder (!%p141_p9), %s1283_s16, 1  ;;  %s161_s19 = sand.u32 (!%p141_p9), 1, %s1226_s13  }
   0xe   : > { %144 = sbr.rel (%p141_p9) target bundleno = 455 (0x1c7), region = 32  ;;  %s887_s20 = sshll.u32 (!%p141_p9), %s161_s19, 3 }
   0xf   : > { %s163_s24 = scalar_lea.vmem (!%p141_p9), [#allocation3], %s887_s20  ;;  %s811_s29 = scalar_lea.sflag (!%p141_p9), [#allocation4], %s161_s19 }
  0x10   : > { %s824_s25 = sshll.u32 (!%p141_p9), %s163_s24, 4  ;;  %s825_s25 = int_to_ptr.vmem [resolvable:$true] %s824_s25 }
  0x11   : > { %s1174_s4 = scalar_lea.vmem (!%p141_p9), %s825_s25, 128 }
  0x12   : > { %p1175_p11 = scmp.ne.s32.totalorder (!%p141_p9), %s825_s25, %s1174_s4 }
  0x13   : > { %v210_v0 = vld [vmem:[%s1917_s1 + $0xf8] sm:$0xff]  ;;  %v1236_v2 = vmov 0   ;;  %v1237_v3 = vmov 2   ;;  %v209_v4 = vld [vmem:[%s1917_s1 + $0xf0] sm:$0xff]  ;;  %s165_s5 = scalar_select %p164_p10, %s1283_s16, 1  ;;  %v1238_v6 = vmov 0.0  }
  0x14   : > { %v194_v1 = vld [vmem:[%s1917_s1 + $0x78] sm:$0xff]  ;;  %1170 = vset.pattern.permute.xlu0 %v1236_v2  ;;  %1172 = vset.pattern.permute.xlu1 %v1237_v3  ;;  %v193_v7 = vld [vmem:[%s1917_s1 + $0x70] sm:$0xff]  ;;  %v208_v9 = vld [vmem:[%s1917_s1 + $0xe8] sm:$0xff]  ;;  %v1239_v35 = vmov 1   ;;  %vm1240_vm0 = vmmov 0   ;;  %vm369_vm4 = vcmask 80896   ;;  %p1176_p12 = pnand %p1175_p11, %p1300_p5 }
  0x15   : > { %v387_v5 = vld [vmem:[%s1918_s2 + $0x78] sm:$0xff]  ;;  %913 = vmatprep.subr.mxu1 %v210_v0  ;;  %1088 = vmatprep.subr.mxu0 %v1238_v6  ;;  %v386_v8 = vld [vmem:[%s1918_s2 + $0x70] sm:$0xff]  ;;  %s1123_s17 = smul.u32 88, %s165_s5  ;;  %v192_v10 = vld [vmem:[%s1917_s1 + $0x68] sm:$0xff]  ;;  %vm808_vm5 = vcmask 261120   ;;  %s1241_s5 = smov [#allocation3]  }
  0x16   : > { %914 = vmatpush3.msra.mxu1 %v194_v1  ;;  %1089 = vmatpush3.msra.mxu0 %v387_v5  ;;  %v385_v11 = vld [vmem:[%s1918_s2 + $0x68] sm:$0xff]  ;;  %v207_v12 = vld [vmem:[%s1917_s1 + $0xe0] sm:$0xff]  ;;  %v206_v16 = vld [vmem:[%s1917_s1 + $0xd8] sm:$0xff]  ;;  %p1177_p13 = pneg %p1176_p12 }
  0x17   : > { %915 = vmatprep.subr.mxu1 %v209_v4  ;;  %1090 = vmatprep.subr.mxu0 %v1238_v6  ;;  %s1348_s30 = scalar_lea.vmem %s1916_s0, %s1123_s17  ;;  %v191_v13 = vld [vmem:[%s1917_s1 + $0x60] sm:$0xff]  ;;  %v190_v18 = vld [vmem:[%s1917_s1 + $0x58] sm:$0xff]  ;;  %v205_v20 = vld [vmem:[%s1917_s1 + $0xd0] sm:$0xff] }
  0x18   : > { %916 = vmatpush3.msra.mxu1 %v193_v7  ;;  %1091 = vmatpush3.msra.mxu0 %v386_v8  ;;  %v384_v14 = vld [vmem:[%s1918_s2 + $0x60] sm:$0xff]  ;;  %v383_v19 = vld [vmem:[%s1918_s2 + $0x58] sm:$0xff]  ;;  %v189_v22 = vld [vmem:[%s1917_s1 + $0x50] sm:$0xff] }
  0x19   : > { %917 = vmatprep.subr.mxu1 %v208_v9  ;;  %1092 = vmatprep.subr.mxu0 %v1238_v6  ;;  %v1358_v15 = vld [vmem:[%s1348_s30] sm:$0xff]  ;;  %v382_v23 = vld [vmem:[%s1918_s2 + $0x50] sm:$0xff]  ;;  %v204_v26 = vld [vmem:[%s1917_s1 + $0xc8] sm:$0xff] }
  0x1a   : > { %918 = vmatpush3.msra.mxu1 %v192_v10  ;;  %1093 = vmatpush3.msra.mxu0 %v385_v11  ;;  %v1124_v17 = vtrunc.f32 %v1358_v15  ;;  %v188_v27 = vld [vmem:[%s1917_s1 + $0x48] sm:$0xff]  ;;  %v203_v29 = vld [vmem:[%s1917_s1 + $0xc0] sm:$0xff]  ;;  %v202_v32 = vld [vmem:[%s1917_s1 + $0xb8] sm:$0xff] }
  0x1b   : > { %919 = vmatprep.subr.mxu1 %v207_v12  ;;  %1094 = vmatprep.subr.mxu0 %v1238_v6  ;;  %v381_v28 = vld [vmem:[%s1918_s2 + $0x48] sm:$0xff]  ;;  %v187_v31 = vld [vmem:[%s1917_s1 + $0x40] sm:$0xff]  ;;  %v186_v33 = vld [vmem:[%s1917_s1 + $0x38] sm:$0xff] }
  0x1c   : > { %920 = vmatpush3.msra.mxu1 %v191_v13  ;;  %1095 = vmatpush3.msra.mxu0 %v384_v14  ;;  %v1125_v21 = vcvt.f32.s32 %v1124_v17  ;;  %v380_v34 = vld [vmem:[%s1918_s2 + $0x40] sm:$0xff]  ;;  %v201_v36 = vld [vmem:[%s1917_s1 + $0xb0] sm:$0xff]  ;;  %v379_v38 = vld [vmem:[%s1918_s2 + $0x38] sm:$0xff] }
  0x1d   : > { %921 = vmatprep.subr.mxu1 %v206_v16  ;;  %1096 = vmatprep.subr.mxu0 %v1238_v6  ;;  %v185_v37 = vld [vmem:[%s1917_s1 + $0x30] sm:$0xff]  ;;  %v200_v39 = vld [vmem:[%s1917_s1 + $0xa8] sm:$0xff]  ;;  %v199_v42 = vld [vmem:[%s1917_s1 + $0xa0] sm:$0xff] }
  0x1e   : > { %922 = vmatpush3.msra.mxu1 %v190_v18  ;;  %1097 = vmatpush3.msra.mxu0 %v383_v19  ;;  %v343_v24 = vadd.s32 10, %v1125_v21  ;;  %v359_v25 = vadd.s32 22, %v1125_v21  ;;  %v351_v30 = vadd.s32 15, %v1125_v21  ;;  %v184_v40 = vld [vmem:[%s1917_s1 + $0x28] sm:$0xff]  ;;  %v378_v41 = vld [vmem:[%s1918_s2 + $0x30] sm:$0xff]  ;;  %v183_v43 = vld [vmem:[%s1917_s1 + $0x20] sm:$0xff] }
  0x1f   : > { %923 = vmatprep.subr.mxu1 %v205_v20  ;;  %1098 = vmatprep.subr.mxu0 %v1238_v6  ;;  %v377_v44 = vld [vmem:[%s1918_s2 + $0x28] sm:$0xff]  ;;  %v198_v45 = vld [vmem:[%s1917_s1 + $0x98] sm:$0xff]  ;;  %v376_v47 = vld [vmem:[%s1918_s2 + $0x20] sm:$0xff] }
  0x20   : > { %924 = vmatpush3.msra.mxu1 %v189_v22  ;;  %1099 = vmatpush3.msra.mxu0 %v382_v23  ;;  %v182_v46 = vld [vmem:[%s1917_s1 + $0x18] sm:$0xff]  ;;  %v197_v48 = vld [vmem:[%s1917_s1 + $0x90] sm:$0xff]  ;;  %v196_v51 = vld [vmem:[%s1917_s1 + $0x88] sm:$0xff] }
  0x21   : > { %345 = vperm.xlu0 %1170, %v343_v24   ;;  %361 = vperm.xlu1 %1172, %v359_v25   ;;  %v181_v49 = vld [vmem:[%s1917_s1 + $0x10] sm:$0xff]  ;;  %v375_v50 = vld [vmem:[%s1918_s2 + $0x18] sm:$0xff]  ;;  %v180_v52 = vld [vmem:[%s1917_s1 + $0x8] sm:$0xff] }
  0x22   : > { %925 = vmatprep.subr.mxu1 %v204_v26  ;;  %1100 = vmatprep.subr.mxu0 %v1238_v6  ;;  %v374_v53 = vld [vmem:[%s1918_s2 + $0x10] sm:$0xff]  ;;  %v195_v54 = vld [vmem:[%s1917_s1 + $0x80] sm:$0xff]  ;;  %v170_v56 = vld [vmem:[%s1348_s30 + $0x8] sm:$0xff] }
  0x23   : > { %926 = vmatpush3.msra.mxu1 %v188_v27  ;;  %1101 = vmatpush3.msra.mxu0 %v381_v28  ;;  %v179_v55 = vld [vmem:[%s1917_s1] sm:$0xff]  ;;  %v373_v57 = vld [vmem:[%s1918_s2 + $0x8] sm:$0xff]  ;;  %v274_v59 = vld [vmem:[%s1917_s1 + $0x2f8] sm:$0xff] }
  0x24   : > { %927 = vmatprep.subr.mxu1 %v203_v29  ;;  %1102 = vmatprep.subr.mxu0 %v1238_v6  ;;  %v372_v58 = vld [vmem:[%s1918_s2] sm:$0xff]  ;;  %v242_v60 = vld [vmem:[%s1917_s1 + $0x1f8] sm:$0xff]  ;;  %v273_v62 = vld [vmem:[%s1917_s1 + $0x2f0] sm:$0xff] }
  0x25   : > { %1171 = vset.pattern.permute.xlu0 %v1239_v35  ;;  %928 = vmatpush3.msra.mxu1 %v187_v31  ;;  %v258_v61 = vld [vmem:[%s1917_s1 + $0x278] sm:$0xff]  ;;  %v257_v63 = vld [vmem:[%s1917_s1 + $0x270] sm:$0xff]  ;;  %v272_v0 = vld [vmem:[%s1917_s1 + $0x2e8] sm:$0xff] }
  0x26   : > { %353 = vperm.xlu0 %1171, %v351_v30   ;;  %929 = vmatprep.subr.mxu1 %v202_v32  ;;  %v256_v1 = vld [vmem:[%s1917_s1 + $0x268] sm:$0xff]  ;;  %v271_v2 = vld [vmem:[%s1917_s1 + $0x2e0] sm:$0xff]  ;;  %v270_v5 = vld [vmem:[%s1917_s1 + $0x2d8] sm:$0xff] }
  0x27   : > { %930 = vmatpush3.msra.mxu1 %v186_v33  ;;  %1103 = vmatpush3.msra.mxu0 %v380_v34  ;;  %v255_v4 = vld [vmem:[%s1917_s1 + $0x260] sm:$0xff]  ;;  %v269_v7 = vld [vmem:[%s1917_s1 + $0x2d0] sm:$0xff]  ;;  %v268_v9 = vld [vmem:[%s1917_s1 + $0x2c8] sm:$0xff] }
  0x28   : > { %931 = vmatprep.subr.mxu1 %v201_v36  ;;  %1104 = vmatprep.subr.mxu0 %v1238_v6  ;;  %v253_v8 = vld [vmem:[%s1917_s1 + $0x250] sm:$0xff]  ;;  %v252_v10 = vld [vmem:[%s1917_s1 + $0x248] sm:$0xff]  ;;  %v267_v11 = vld [vmem:[%s1917_s1 + $0x2c0] sm:$0xff] }
  0x29   : > { %932 = vmatpush3.msra.mxu1 %v185_v37  ;;  %1105 = vmatpush3.msra.mxu0 %v379_v38  ;;  %v251_v12 = vld [vmem:[%s1917_s1 + $0x240] sm:$0xff]  ;;  %v266_v13 = vld [vmem:[%s1917_s1 + $0x2b8] sm:$0xff]  ;;  %v249_v16 = vld [vmem:[%s1917_s1 + $0x230] sm:$0xff] }
  0x2a   : > { %933 = vmatprep.subr.mxu1 %v200_v39  ;;  %1106 = vmatprep.subr.mxu0 %v1238_v6  ;;  %v250_v14 = vld [vmem:[%s1917_s1 + $0x238] sm:$0xff]  ;;  %v264_v17 = vld [vmem:[%s1917_s1 + $0x2a8] sm:$0xff]  ;;  %v263_v19 = vld [vmem:[%s1917_s1 + $0x2a0] sm:$0xff] }
  0x2b   : > { %934 = vmatpush3.msra.mxu1 %v184_v40  ;;  %1107 = vmatpush3.msra.mxu0 %v378_v41  ;;  %v248_v18 = vld [vmem:[%s1917_s1 + $0x228] sm:$0xff]  ;;  %v247_v20 = vld [vmem:[%s1917_s1 + $0x220] sm:$0xff]  ;;  %v262_v21 = vld [vmem:[%s1917_s1 + $0x298] sm:$0xff] }
  0x2c   : > { %935 = vmatprep.subr.mxu1 %v199_v42  ;;  %1108 = vmatprep.subr.mxu0 %v1238_v6  ;;  %v246_v22 = vld [vmem:[%s1917_s1 + $0x218] sm:$0xff]  ;;  %v261_v23 = vld [vmem:[%s1917_s1 + $0x290] sm:$0xff]  ;;  %v174_v25 = vld [vmem:[%s1348_s30 + $0x28] sm:$0xff] }
  0x2d   : > { %936 = vmatpush3.msra.mxu1 %v183_v43  ;;  %1109 = vmatpush3.msra.mxu0 %v377_v44  ;;  %v245_v24 = vld [vmem:[%s1917_s1 + $0x210] sm:$0xff]  ;;  %v260_v26 = vld [vmem:[%s1917_s1 + $0x288] sm:$0xff]  ;;  %v259_v28 = vld [vmem:[%s1917_s1 + $0x280] sm:$0xff] }
  0x2e   : > { %937 = vmatprep.subr.mxu1 %v198_v45  ;;  %1110 = vmatprep.subr.mxu0 %v1238_v6  ;;  %v244_v27 = vld [vmem:[%s1917_s1 + $0x208] sm:$0xff]  ;;  %v243_v29 = vld [vmem:[%s1917_s1 + $0x200] sm:$0xff]  ;;  %v338_v30 = vld [vmem:[%s1917_s1 + $0x4f8] sm:$0xff] }
  0x2f   : > { %938 = vmatpush3.msra.mxu1 %v182_v46  ;;  %1111 = vmatpush3.msra.mxu0 %v376_v47  ;;  %v173_v31 = vld [vmem:[%s1348_s30 + $0x20] sm:$0xff]  ;;  %v322_v32 = vld [vmem:[%s1917_s1 + $0x478] sm:$0xff]  ;;  %v337_v33 = vld [vmem:[%s1917_s1 + $0x4f0] sm:$0xff] }
  0x30   : > { %939 = vmatprep.subr.mxu1 %v197_v48  ;;  %1112 = vmatprep.subr.mxu0 %v1238_v6  ;;  %v321_v34 = vld [vmem:[%s1917_s1 + $0x470] sm:$0xff]  ;;  %v336_v35 = vld [vmem:[%s1917_s1 + $0x4e8] sm:$0xff]  ;;  %v335_v37 = vld [vmem:[%s1917_s1 + $0x4e0] sm:$0xff] }
  0x31   : > { %940 = vmatpush3.msra.mxu1 %v181_v49  ;;  %1113 = vmatpush3.msra.mxu0 %v375_v50  ;;  %v320_v36 = vld [vmem:[%s1917_s1 + $0x468] sm:$0xff]  ;;  %v319_v38 = vld [vmem:[%s1917_s1 + $0x460] sm:$0xff]  ;;  %v334_v39 = vld [vmem:[%s1917_s1 + $0x4d8] sm:$0xff] }
  0x32   : > { %941 = vmatprep.subr.mxu1 %v196_v51  ;;  %1114 = vmatprep.subr.mxu0 %v1238_v6  ;;  %v318_v40 = vld [vmem:[%s1917_s1 + $0x458] sm:$0xff]  ;;  %v333_v41 = vld [vmem:[%s1917_s1 + $0x4d0] sm:$0xff]  ;;  %v332_v43 = vld [vmem:[%s1917_s1 + $0x4c8] sm:$0xff] }
  0x33   : > { %942 = vmatpush3.msra.mxu1 %v180_v52  ;;  %1115 = vmatpush3.msra.mxu0 %v374_v53  ;;  %v317_v42 = vld [vmem:[%s1917_s1 + $0x450] sm:$0xff]  ;;  %v316_v44 = vld [vmem:[%s1917_s1 + $0x448] sm:$0xff]  ;;  %v331_v45 = vld [vmem:[%s1917_s1 + $0x4c0] sm:$0xff] }
  0x34   : > { %943 = vmatprep.subr.mxu1 %v195_v54  ;;  %1116 = vmatprep.subr.mxu0 %v1238_v6  ;;  %v315_v46 = vld [vmem:[%s1917_s1 + $0x440] sm:$0xff]  ;;  %v330_v47 = vld [vmem:[%s1917_s1 + $0x4b8] sm:$0xff]  ;;  %v329_v49 = vld [vmem:[%s1917_s1 + $0x4b0] sm:$0xff] }
  0x35   : > { %944 = vmatpush3.msra.mxu1 %v179_v55  ;;  %522 = vmatprep.mubr.f32.mxu1 %v170_v56  ;;  %v314_v48 = vld [vmem:[%s1917_s1 + $0x438] sm:$0xff]  ;;  %v313_v50 = vld [vmem:[%s1917_s1 + $0x430] sm:$0xff]  ;;  %v328_v51 = vld [vmem:[%s1917_s1 + $0x4a8] sm:$0xff] }
  0x36   : > { %1117 = vmatpush3.msra.mxu0 %v373_v57  ;;  %523 = vmatmul.mubr.f32.vlgmr.msra.gmra.mxu1 %v1358_v15  ;;  %v265_v15 = vld [vmem:[%s1917_s1 + $0x2b0] sm:$0xff]  ;;  %v312_v52 = vld [vmem:[%s1917_s1 + $0x428] sm:$0xff]  ;;  %v327_v53 = vld [vmem:[%s1917_s1 + $0x4a0] sm:$0xff] }
  0x37   : > { %1118 = vmatprep.subr.mxu0 %v1238_v6  ;;  %1120 = vmatprep.mubr.msk.f32.mxu0 %vm1240_vm0, %v1238_v6  ;;  %v311_v54 = vld [vmem:[%s1917_s1 + $0x420] sm:$0xff]  ;;  %v326_v55 = vld [vmem:[%s1917_s1 + $0x498] sm:$0xff]  ;;  %v325_v57 = vld [vmem:[%s1917_s1 + $0x490] sm:$0xff] }
  0x38   : > { %1119 = vmatpush3.msra.mxu0 %v372_v58  ;;  %983 = vmatprep.subr.mxu1 %v274_v59  ;;  %v310_v56 = vld [vmem:[%s1917_s1 + $0x418] sm:$0xff]  ;;  %v309_v58 = vld [vmem:[%s1917_s1 + $0x410] sm:$0xff]  ;;  %v178_v59 = vld [vmem:[%s1348_s30 + $0x48] sm:$0xff] }
  0x39   : > { %948 = vmatprep.subr.mxu0 %v242_v60  ;;  %984 = vmatpush3.msra.mxu1 %v258_v61  ;;  %v324_v60 = vld [vmem:[%s1917_s1 + $0x488] sm:$0xff] }
  0x3a   : > { %985 = vmatprep.subr.mxu1 %v273_v62  ;;  %1173 = vset.pattern.permute.xlu0 %v1237_v3  ;;  %v254_v3 = vld [vmem:[%s1917_s1 + $0x258] sm:$0xff]  ;;  %v308_v61 = vld [vmem:[%s1917_s1 + $0x408] sm:$0xff]  ;;  %v323_v62 = vld [vmem:[%s1917_s1 + $0x480] sm:$0xff] }
  0x3b   : > { %986 = vmatpush3.msra.mxu1 %v257_v63  ;;  %662 = vmatprep.mubr.f32.mxu1 %v174_v25  ;;  %v307_v63 = vld [vmem:[%s1917_s1 + $0x400] sm:$0xff]  ;;  %v236_v25 = vld [vmem:[%s1917_s1 + $0x1c8] sm:$0xff] }
  0x3c   : > { %987 = vmatprep.subr.mxu1 %v272_v0  ;;  %v177_v0 = vld [vmem:[%s1348_s30 + $0x40] sm:$0xff] }
  0x3d   : > { %988 = vmatpush3.msra.mxu1 %v256_v1  ;;  %v339_v1 = vlaneseq }
  0x3e   : > { %989 = vmatprep.subr.mxu1 %v271_v2 }
  0x3f   : > { %990 = vmatpush3.msra.mxu1 %v255_v4  ;;  %v340_v2 = vand.u32 127, %v339_v1  ;;  %v297_v1 = vld [vmem:[%s1917_s1 + $0x3b0] sm:$0xff] }
  0x40   : > { %991 = vmatprep.subr.mxu1 %v270_v5 }
  0x41   : > { %992 = vmatpush3.msra.mxu1 %v254_v3 }
  0x42   : > { %993 = vmatprep.subr.mxu1 %v269_v7 }
  0x43   : > { %994 = vmatpush3.msra.mxu1 %v253_v8 }
  0x44   : > { %995 = vmatprep.subr.mxu1 %v268_v9 }
  0x45   : > { %996 = vmatpush3.msra.mxu1 %v252_v10 }
  0x46   : > { %997 = vmatprep.subr.mxu1 %v267_v11  ;;  %v368_v11 = vld [vmem:[%s1348_s30 + $0x50] sm:$0xff] }
  0x47   : > { %998 = vmatpush3.msra.mxu1 %v251_v12 }
  0x48   : > { %999 = vmatprep.subr.mxu1 %v266_v13  ;;  %v226_v13 = vld [vmem:[%s1917_s1 + $0x178] sm:$0xff] }
  0x49   : > { %1000 = vmatpush3.msra.mxu1 %v250_v14  ;;  %v172_v14 = vld [vmem:[%s1348_s30 + $0x18] sm:$0xff] }
  0x4a   : > { %1001 = vmatprep.subr.mxu1 %v265_v15 }
  0x4b   : > { %1002 = vmatpush3.msra.mxu1 %v249_v16  ;;  %v241_v16 = vld [vmem:[%s1917_s1 + $0x1f0] sm:$0xff] }
  0x4c   : > { %1003 = vmatprep.subr.mxu1 %v264_v17  ;;  %v240_v17 = vld [vmem:[%s1917_s1 + $0x1e8] sm:$0xff] }
  0x4d   : > { %1004 = vmatpush3.msra.mxu1 %v248_v18  ;;  %v224_v18 = vld [vmem:[%s1917_s1 + $0x168] sm:$0xff] }
  0x4e   : > { %1005 = vmatprep.subr.mxu1 %v263_v19  ;;  %v239_v19 = vld [vmem:[%s1917_s1 + $0x1e0] sm:$0xff] }
  0x4f   : > { %1006 = vmatpush3.msra.mxu1 %v247_v20  ;;  %v223_v20 = vld [vmem:[%s1917_s1 + $0x160] sm:$0xff] }
  0x50   : > { %1007 = vmatprep.subr.mxu1 %v262_v21  ;;  %v238_v21 = vld [vmem:[%s1917_s1 + $0x1d8] sm:$0xff] }
  0x51   : > { %1008 = vmatpush3.msra.mxu1 %v246_v22  ;;  %v222_v22 = vld [vmem:[%s1917_s1 + $0x158] sm:$0xff] }
  0x52   : > { %1009 = vmatprep.subr.mxu1 %v261_v23  ;;  %v237_v23 = vld [vmem:[%s1917_s1 + $0x1d0] sm:$0xff] }
  0x53   : > { %1010 = vmatpush3.msra.mxu1 %v245_v24  ;;  %v221_v24 = vld [vmem:[%s1917_s1 + $0x150] sm:$0xff] }
  0x54   : > { %1011 = vmatprep.subr.mxu1 %v260_v26  ;;  %v220_v26 = vld [vmem:[%s1917_s1 + $0x148] sm:$0xff] }
  0x55   : > { %1012 = vmatpush3.msra.mxu1 %v244_v27  ;;  %v235_v27 = vld [vmem:[%s1917_s1 + $0x1c0] sm:$0xff] }
  0x56   : > { %1013 = vmatprep.subr.mxu1 %v259_v28  ;;  %v219_v28 = vld [vmem:[%s1917_s1 + $0x140] sm:$0xff] }
  0x57   : > { %1014 = vmatpush3.msra.mxu1 %v243_v29  ;;  %v234_v29 = vld [vmem:[%s1917_s1 + $0x1b8] sm:$0xff] }
  0x58   : > { %1053 = vmatprep.subr.mxu1 %v338_v30  ;;  %663 = vmatmul.mubr.f32.vlgmr.msra.gmra.mxu1 %v173_v31  ;;  %v218_v30 = vld [vmem:[%s1917_s1 + $0x138] sm:$0xff]  ;;  %v233_v31 = vld [vmem:[%s1917_s1 + $0x1b0] sm:$0xff] }
  0x59   : > { %1054 = vmatpush3.msra.mxu1 %v322_v32  ;;  %802 = vmatprep.mubr.f32.mxu1 %v178_v59  ;;  %v217_v32 = vld [vmem:[%s1917_s1 + $0x130] sm:$0xff]  ;;  %v300_v59 = vld [vmem:[%s1917_s1 + $0x3c8] sm:$0xff] }
  0x5a   : > { %1055 = vmatprep.subr.mxu1 %v337_v33  ;;  %v232_v33 = vld [vmem:[%s1917_s1 + $0x1a8] sm:$0xff] }
  0x5b   : > { %1056 = vmatpush3.msra.mxu1 %v321_v34  ;;  %v216_v34 = vld [vmem:[%s1917_s1 + $0x128] sm:$0xff] }
  0x5c   : > { %1057 = vmatprep.subr.mxu1 %v336_v35  ;;  %v231_v35 = vld [vmem:[%s1917_s1 + $0x1a0] sm:$0xff] }
  0x5d   : > { %1058 = vmatpush3.msra.mxu1 %v320_v36  ;;  %v215_v36 = vld [vmem:[%s1917_s1 + $0x120] sm:$0xff] }
  0x5e   : > { %1059 = vmatprep.subr.mxu1 %v335_v37  ;;  %v230_v37 = vld [vmem:[%s1917_s1 + $0x198] sm:$0xff] }
  0x5f   : > { %1060 = vmatpush3.msra.mxu1 %v319_v38  ;;  %v214_v38 = vld [vmem:[%s1917_s1 + $0x118] sm:$0xff] }
  0x60   : > { %1061 = vmatprep.subr.mxu1 %v334_v39  ;;  %v229_v39 = vld [vmem:[%s1917_s1 + $0x190] sm:$0xff] }
  0x61   : > { %1062 = vmatpush3.msra.mxu1 %v318_v40  ;;  %v213_v40 = vld [vmem:[%s1917_s1 + $0x110] sm:$0xff] }
  0x62   : > { %1063 = vmatprep.subr.mxu1 %v333_v41  ;;  %v228_v41 = vld [vmem:[%s1917_s1 + $0x188] sm:$0xff] }
  0x63   : > { %1064 = vmatpush3.msra.mxu1 %v317_v42  ;;  %v212_v42 = vld [vmem:[%s1917_s1 + $0x108] sm:$0xff] }
  0x64   : > { %1065 = vmatprep.subr.mxu1 %v332_v43  ;;  %v227_v43 = vld [vmem:[%s1917_s1 + $0x180] sm:$0xff] }
  0x65   : > { %1066 = vmatpush3.msra.mxu1 %v316_v44  ;;  %v211_v44 = vld [vmem:[%s1917_s1 + $0x100] sm:$0xff] }
  0x66   : > { %1067 = vmatprep.subr.mxu1 %v331_v45  ;;  %v171_v45 = vld [vmem:[%s1348_s30 + $0x10] sm:$0xff] }
  0x67   : > { %1068 = vmatpush3.msra.mxu1 %v315_v46  ;;  %v306_v46 = vld [vmem:[%s1917_s1 + $0x3f8] sm:$0xff] }
  0x68   : > { %1069 = vmatprep.subr.mxu1 %v330_v47  ;;  %v290_v47 = vld [vmem:[%s1917_s1 + $0x378] sm:$0xff] }
  0x69   : > { %1070 = vmatpush3.msra.mxu1 %v314_v48  ;;  %v176_v48 = vld [vmem:[%s1348_s30 + $0x38] sm:$0xff] }
  0x6a   : > { %1071 = vmatprep.subr.mxu1 %v329_v49  ;;  %v305_v49 = vld [vmem:[%s1917_s1 + $0x3f0] sm:$0xff] }
  0x6b   : > { %1072 = vmatpush3.msra.mxu1 %v313_v50  ;;  %v289_v50 = vld [vmem:[%s1917_s1 + $0x370] sm:$0xff] }
  0x6c   : > { %1073 = vmatprep.subr.mxu1 %v328_v51  ;;  %v304_v51 = vld [vmem:[%s1917_s1 + $0x3e8] sm:$0xff] }
  0x6d   : > { %1074 = vmatpush3.msra.mxu1 %v312_v52  ;;  %v288_v52 = vld [vmem:[%s1917_s1 + $0x368] sm:$0xff] }
  0x6e   : > { %1075 = vmatprep.subr.mxu1 %v327_v53  ;;  %v303_v53 = vld [vmem:[%s1917_s1 + $0x3e0] sm:$0xff] }
  0x6f   : > { %1076 = vmatpush3.msra.mxu1 %v311_v54  ;;  %v287_v54 = vld [vmem:[%s1917_s1 + $0x360] sm:$0xff] }
  0x70   : > { %1077 = vmatprep.subr.mxu1 %v326_v55  ;;  %v302_v55 = vld [vmem:[%s1917_s1 + $0x3d8] sm:$0xff] }
  0x71   : > { %1078 = vmatpush3.msra.mxu1 %v310_v56  ;;  %v286_v56 = vld [vmem:[%s1917_s1 + $0x358] sm:$0xff] }
  0x72   : > { %1079 = vmatprep.subr.mxu1 %v325_v57  ;;  %v301_v57 = vld [vmem:[%s1917_s1 + $0x3d0] sm:$0xff] }
  0x73   : > { %1080 = vmatpush3.msra.mxu1 %v309_v58  ;;  %v285_v58 = vld [vmem:[%s1917_s1 + $0x350] sm:$0xff] }
  0x74   : > { %1081 = vmatprep.subr.mxu1 %v324_v60  ;;  %v284_v60 = vld [vmem:[%s1917_s1 + $0x348] sm:$0xff] }
  0x75   : > { %1082 = vmatpush3.msra.mxu1 %v308_v61  ;;  %v299_v61 = vld [vmem:[%s1917_s1 + $0x3c0] sm:$0xff] }
  0x76   : > { %1083 = vmatprep.subr.mxu1 %v323_v62  ;;  %v283_v62 = vld [vmem:[%s1917_s1 + $0x340] sm:$0xff] }
  0x77   : > { %1084 = vmatpush3.msra.mxu1 %v307_v63  ;;  %v298_v63 = vld [vmem:[%s1917_s1 + $0x3b8] sm:$0xff] }
  0x78   : > { %803 = vmatmul.mubr.f32.vlgmr.msra.gmra.mxu1 %v177_v0  ;;  %v282_v0 = vld [vmem:[%s1917_s1 + $0x338] sm:$0xff] }
  0x9c   : > { %v346_v4 = vpop.permute.xlu0 %345  ;;  %v362_v5 = vpop.permute.xlu1 %361 }
  0x9d   : > { %vm347_vm1 = vcmp.eq.s32.totalorder %v340_v2, %v346_v4  ;;  %vm363_vm2 = vcmp.eq.s32.totalorder %v340_v2, %v362_v5  ;;  %v296_v4 = vld [vmem:[%s1917_s1 + $0x3a8] sm:$0xff] }
  0x9e   : > { %v889_v7 = vsel %vm347_vm1, 1.0, %v1238_v6  ;;  %v891_v9 = vsel %vm363_vm2, 1.0, %v1238_v6  ;;  %v280_v5 = vld [vmem:[%s1917_s1 + $0x328] sm:$0xff] }
  0xa1   : > { %v354_v3 = vpop.permute.xlu0 %353 }
  0xa2   : > { %vm355_vm3 = vcmp.eq.s32.totalorder %v340_v2, %v354_v3  ;;  %v281_v2 = vld [vmem:[%s1917_s1 + $0x330] sm:$0xff]  ;;  %v295_v3 = vld [vmem:[%s1917_s1 + $0x3a0] sm:$0xff] }
  0xa3   : > { %v890_v8 = vsel %vm355_vm3, 1.0, %v1238_v6  ;;  %v225_v6 = vld [vmem:[%s1917_s1 + $0x170] sm:$0xff] }
  0xa4   : > { %v358_v10 = vadd.f32 %v890_v8, %v889_v7  ;;  %v279_v7 = vld [vmem:[%s1917_s1 + $0x320] sm:$0xff]  ;;  %v294_v8 = vld [vmem:[%s1917_s1 + $0x398] sm:$0xff] }
  0xa6   : > { %v366_v12 = vadd.f32 %v891_v9, %v358_v10  ;;  %v278_v9 = vld [vmem:[%s1917_s1 + $0x318] sm:$0xff]  ;;  %v293_v10 = vld [vmem:[%s1917_s1 + $0x390] sm:$0xff] }
  0xa8   : > { %367 = vst [vmem:[#allocation2] sm:$0xff] %v366_v12  ;;  %v292_v12 = vld [vmem:[%s1917_s1 + $0x388] sm:$0xff] }
  0xa9   : > { %370 = vst.msk [vmem:[#allocation2] sm:$0xff] %vm369_vm4, %v368_v11  ;;  %v277_v11 = vld [vmem:[%s1917_s1 + $0x310] sm:$0xff] }
  0xb0   : > { %v371_v15 = vld [vmem:[#allocation2] sm:$0xff] }
  0xb1   : > { %1121 = vmatmul.mubr.f32.vlgmr.msra.gmra.mxu0 %v371_v15  ;;  %v275_v15 = vld [vmem:[%s1917_s1 + $0x300] sm:$0xff] }
  0xb2   : > { %949 = vmatpush3.msra.mxu0 %v226_v13  ;;  %592 = vmatprep.mubr.f32.mxu0 %v172_v14  ;;  %v276_v13 = vld [vmem:[%s1917_s1 + $0x308] sm:$0xff]  ;;  %v291_v14 = vld [vmem:[%s1917_s1 + $0x380] sm:$0xff] }
  0xb3   : > { %950 = vmatprep.subr.mxu0 %v241_v16  ;;  %v175_v16 = vld [vmem:[%s1348_s30 + $0x30] sm:$0xff]  ;;  %s893_s30 = sshll.u32 %s1283_s16, 7  ;;  %s1178_s16 = sshll.u32 %s1241_s5, 4  ;;  %s1179_s16 = int_to_ptr.vmem [resolvable:$false] %s1178_s16 }
  0xb4   : > { %951 = vmatpush3.msra.mxu0 %v225_v6  ;;  %s822_s28 = scalar_lea.hbm %s1919_s3, %s893_s30  ;;  %s1180_s6 = scalar_lea.vmem %s1179_s16, 256 }
  0xb5   : > { %952 = vmatprep.subr.mxu0 %v240_v17  ;;  %p1181_p0 = scmp.lt.s32.totalorder %s825_s25, %s1179_s16  ;;  %p1182_p1 = scmp.lt.s32.totalorder %s1180_s6, %s1174_s4 }
  0xb6   : > { %953 = vmatpush3.msra.mxu0 %v224_v18 }
  0xb7   : > { %954 = vmatprep.subr.mxu0 %v239_v19  ;;  %p1183_p2 = por %p1182_p1, %p1181_p0 }
  0xb8   : > { %955 = vmatpush3.msra.mxu0 %v223_v20 }
  0xb9   : > { %956 = vmatprep.subr.mxu0 %v238_v21  ;;  %p1184_p3 = pnand %p1183_p2, %p1177_p13 }
  0xba   : > { %957 = vmatpush3.msra.mxu0 %v222_v22 }
  0xbb   : > { %958 = vmatprep.subr.mxu0 %v237_v23 }
  0xbc   : > { %959 = vmatpush3.msra.mxu0 %v221_v24 }
  0xbd   : > { %960 = vmatprep.subr.mxu0 %v236_v25 }
  0xbe   : > { %961 = vmatpush3.msra.mxu0 %v220_v26 }
  0xbf   : > { %962 = vmatprep.subr.mxu0 %v235_v27 }
  0xc0   : > { %963 = vmatpush3.msra.mxu0 %v219_v28 }
  0xc1   : > { %964 = vmatprep.subr.mxu0 %v234_v29 }
  0xc2   : > { %965 = vmatpush3.msra.mxu0 %v218_v30 }
  0xc3   : > { %966 = vmatprep.subr.mxu0 %v233_v31 }
  0xc4   : > { %967 = vmatpush3.msra.mxu0 %v217_v32 }
  0xc5   : > { %968 = vmatprep.subr.mxu0 %v232_v33 }
  0xc6   : > { %969 = vmatpush3.msra.mxu0 %v216_v34 }
  0xc7   : > { %970 = vmatprep.subr.mxu0 %v231_v35 }
  0xc8   : > { %971 = vmatpush3.msra.mxu0 %v215_v36 }
  0xc9   : > { %972 = vmatprep.subr.mxu0 %v230_v37 }
  0xca   : > { %973 = vmatpush3.msra.mxu0 %v214_v38 }
  0xcb   : > { %974 = vmatprep.subr.mxu0 %v229_v39 }
  0xcc   : > { %975 = vmatpush3.msra.mxu0 %v213_v40 }
  0xcd   : > { %976 = vmatprep.subr.mxu0 %v228_v41 }
  0xce   : > { %977 = vmatpush3.msra.mxu0 %v212_v42 }
  0xcf   : > { %978 = vmatprep.subr.mxu0 %v227_v43 }
  0xd0   : > { %979 = vmatpush3.msra.mxu0 %v211_v44 }
  0xd1   : > { %593 = vmatmul.mubr.f32.vlgmr.msra.gmra.mxu0 %v171_v45  ;;  %1018 = vmatprep.subr.mxu0 %v306_v46 }
  0xd2   : > { %1019 = vmatpush3.msra.mxu0 %v290_v47  ;;  %732 = vmatprep.mubr.f32.mxu0 %v176_v48 }
  0xd3   : > { %1020 = vmatprep.subr.mxu0 %v305_v49 }
  0xd4   : > { %1021 = vmatpush3.msra.mxu0 %v289_v50 }
  0xd5   : > { %1022 = vmatprep.subr.mxu0 %v304_v51 }
  0xd6   : > { %1023 = vmatpush3.msra.mxu0 %v288_v52 }
  0xd7   : > { %1024 = vmatprep.subr.mxu0 %v303_v53 }
  0xd8   : > { %1025 = vmatpush3.msra.mxu0 %v287_v54 }
  0xd9   : > { %1026 = vmatprep.subr.mxu0 %v302_v55 }
  0xda   : > { %1027 = vmatpush3.msra.mxu0 %v286_v56 }
  0xdb   : > { %1028 = vmatprep.subr.mxu0 %v301_v57 }
  0xdc   : > { %1029 = vmatpush3.msra.mxu0 %v285_v58 }
  0xdd   : > { %1030 = vmatprep.subr.mxu0 %v300_v59 }
  0xde   : > { %1031 = vmatpush3.msra.mxu0 %v284_v60 }
  0xdf   : > { %1032 = vmatprep.subr.mxu0 %v299_v61 }
  0xe0   : > { %1033 = vmatpush3.msra.mxu0 %v283_v62 }
  0xe1   : > { %1034 = vmatprep.subr.mxu0 %v298_v63 }
  0xe2   : > { %1035 = vmatpush3.msra.mxu0 %v282_v0 }
  0xe3   : > { %1036 = vmatprep.subr.mxu0 %v297_v1 }
  0xe4   : > { %1037 = vmatpush3.msra.mxu0 %v281_v2 }
  0xe5   : > { %1038 = vmatprep.subr.mxu0 %v296_v4 }
  0xe6   : > { %1039 = vmatpush3.msra.mxu0 %v280_v5 }
  0xe7   : > { %1040 = vmatprep.subr.mxu0 %v295_v3 }
  0xe8   : > { %1041 = vmatpush3.msra.mxu0 %v279_v7 }
  0xe9   : > { %1042 = vmatprep.subr.mxu0 %v294_v8 }
  0xea   : > { %1043 = vmatpush3.msra.mxu0 %v278_v9 }
  0xeb   : > { %1044 = vmatprep.subr.mxu0 %v293_v10 }
  0xec   : > { %1045 = vmatpush3.msra.mxu0 %v277_v11 }
  0xed   : > { %1046 = vmatprep.subr.mxu0 %v292_v12 }
  0xee   : > { %1047 = vmatpush3.msra.mxu0 %v276_v13 }
  0xef   : > { %1048 = vmatprep.subr.mxu0 %v291_v14 }
  0xf0   : > { %1049 = vmatpush3.msra.mxu0 %v275_v15 }
  0xf1   : > { %733 = vmatmul.mubr.f32.vlgmr.msra.gmra.mxu0 %v175_v16 }
  0xf6   : > { %v945_v18 = vpop.f32.mrf.mxu1 }
  0xf8   : > { %v946_v20 = vpop.f32.mrf.mxu1 }
  0xf9   : > { %v947_v23 = vadd.f32 %v946_v20, %v945_v18 }
 0x118   : > { %v1015_v21 = vpop.f32.mrf.mxu1 }
 0x11a   : > { %v1016_v25 = vpop.f32.mrf.mxu1 }
 0x11b   : > { %v1017_v29 = vadd.f32 %v1016_v25, %v1015_v21 }
 0x138   : > { %v1085_v27 = vpop.f32.mrf.mxu1 }
 0x13a   : > { %v1086_v32 = vpop.f32.mrf.mxu1 }
 0x13b   : > { %v1087_v36 = vadd.f32 %v1086_v32, %v1085_v27 }
 0x171   : > { %v454_v6 = vpop.f32.mrf.mxu0 }
 0x172   : > { %v525_v26 = vadd.f32 %v947_v23, %v454_v6 }
 0x173   : > { %v1122_v17 = vpop.f32.mrf.mxu0 }
 0x191   : > { %v980_v19 = vpop.f32.mrf.mxu0 }
 0x193   : > { %v981_v22 = vpop.f32.mrf.mxu0 }
 0x194   : > { %v982_v24 = vadd.f32 %v981_v22, %v980_v19 }
 0x196   : > { %v595_v28 = vadd.f32 %v982_v24, %v525_v26 }
 0x198   : > { %v665_v33 = vadd.f32 %v1017_v29, %v595_v28 }
 0x1b1   : > { %v1050_v30 = vpop.f32.mrf.mxu0 }
 0x1b3   : > { %v1051_v31 = vpop.f32.mrf.mxu0 }
 0x1b4   : > { %v1052_v34 = vadd.f32 %v1051_v31, %v1050_v30 }
 0x1b6   : > { %v735_v35 = vadd.f32 %v1052_v34, %v665_v33 }
 0x1b8   : > { %v805_v37 = vadd.f32 %v1087_v36, %v735_v35 }
 0x1ba   : > { %809 = vst.msk [vmem:[%s163_s24] sm:$0xff] %vm808_vm5, %v805_v37 }
 0x1bb   : > { %1187 = shalt.err (!%p1184_p3)
}
 0x1bc   : > { %s1188_s7 = scalar_lea.hbm %s822_s28, 128  ;;  %s1192_s10 = scalar_lea.hbm %s1919_s3, 256 }
 0x1bd   : > { %p1189_p4 = scmp.ne.s32.totalorder %s822_s28, %s1188_s7  ;;  %p1193_p9 = scmp.lt.s32.totalorder %s822_s28, %s1919_s3 }
 0x1be   : > { %p1194_p10 = scmp.lt.s32.totalorder %s1192_s10, %s1188_s7 }
 0x1bf   : > { %p1190_p7 = pnand %p1189_p4, %p1300_p5 }
 0x1c0   : > { %p1195_p11 = por %p1194_p10, %p1193_p9 }
 0x1c1   : > { %p1191_p8 = pneg %p1190_p7 }
 0x1c3   : > { %p1196_p12 = pnand %p1195_p11, %p1191_p8 }
 0x1c5   : > { %1199 = shalt.err (!%p1196_p12)
}
 0x1c6   : > { %1126 = dma.vmem_to_hbm [thread:$0]  (%p1300_p5), %s825_s25, 128, %s822_s28, %s811_s29  }
 0x1c7 PF: > { %p1132_p13 = scmp.ge.s32.totalorder %s1234_s15, 2  ;;  %s836_s19 = sand.u32 1, %s1222_s12  }
 0x1c8   : > { %s837_s20 = scalar_lea.sflag [#allocation4], %s836_s19 }
 0x1c9   : > { %p1129_p0 = pnand %p1132_p13, %p1304_p6 }
 0x1cb   : > { %p1130_p1 = pneg %p1129_p0 }
 0x1cd   : > { %1217 = dma.done.wait (%p1130_p1), %s837_s20, 128  }
 0x1ce   : > { %1219 = vsyncadd (%p1130_p1), %s837_s20, 4294967168  ;;  %p13_p2 = scmp.ge.s32.totalorder %s1287_s18, 4   ;;  %s1922_s12 = smov %s1226_s13 }
 0x1cf   : > { %s1923_s13 = smov %s1230_s14  ;;  %s1924_s14 = smov %s1298_s21 }
 0x1d0   : > { %s1925_s15 = smov %s1287_s18  ;;  %15 = sbr.rel (!%p13_p2) target bundleno = 3 (0x3), region = 67 }
 0x1d5   :  { %842 = vsyncpa [#allocation4], 1 }
 0x1d6   :  { %844 = vsyncpa [#allocation4 + $0x1], 1 }

</bundles_post_ra>
